<compile_context>
chip_gen: v7x
topology: tpu7x:2x2x1
jax: 0.10.0
libtpu: 0.0.40
codegen_flags: <defaults>
</compile_context>

<pallas_src>
import jax
import jax.numpy as jnp
from jax import lax
import numpy as np
from jax.experimental import pallas as pl
from jax.experimental.pallas import tpu as pltpu

EPS = 1e-5  # nn.BatchNorm2d default eps


def _make_kernel(K, s, Cout, H, Wm):
    """Build the per-image kernel (all shape params are static Python ints)."""
    HWm = H * Wm

    def kernel(x_ref, w_ref, shift_ref, o_ref, acc_ref):
        # x_ref    : (1, Cin, H*Wm)    bf16  — compact input, rows zero-padded W -> Wm
        # w_ref    : (K*K*Cout, Cin)   bf16  — tap-major (kh*K+kw), BN scale folded in
        # shift_ref: (s*s*Cout, 1)     f32   — folded (bias - mean)*scale + beta, per phase row
        # o_ref    : (1, s*s*Cout, L)  f32   — phase-separated, flattened spatial (lane-dense)
        # acc_ref  : (s*s*Cout, L)     f32   — VMEM scratch accumulator

        # Single MXU matmul: every tap's contribution for the whole image.
        y = jnp.dot(w_ref[...], x_ref[0],
                    preferred_element_type=jnp.float32)        # (K*K*Cout, H*Wm) f32

        acc_ref[...] = jnp.zeros_like(acc_ref)
        # Scatter each tap into its stride-phase plane at a static (dh, dw) offset.
        # Output position: q = s*ih + kh  ->  phase kh%s, plane row ih + kh//s.
        for kh in range(K):
            for kw in range(K):
                tap = kh * K + kw
                phase = (kh % s) * s + (kw % s)
                off = (kh // s) * Wm + (kw // s)
                acc_ref[phase * Cout:(phase + 1) * Cout, off:off + HWm] += (
                    y[tap * Cout:(tap + 1) * Cout, :])

        # Folded (conv bias + BatchNorm) shift, then ReLU — fully lane-dense epilogue.
        out = jnp.maximum(acc_ref[...] + shift_ref[...], 0.0)
        # TODO(synk): nn.Dropout(p=0.5) is identity in eval mode; training-mode RNG masking
        # and training-mode BatchNorm batch statistics are not reproduced here.
        o_ref[0] = out.astype(o_ref.dtype)

    return kernel


def deconv_block(x_nchw, w_t, bias, gamma, beta, mean, var,
                 *, stride=2, padding=1, output_padding=0):
    """ConvTranspose2d(+bias) -> BatchNorm2d(running stats) -> ReLU, eval mode. NCHW in/out."""
    x_nchw = x_nchw.astype(jnp.float32)
    N, Cin, H, W = x_nchw.shape
    Cin_w, Cout, K, Kw = w_t.shape
    assert Cin == Cin_w and K == Kw
    s, p, op = stride, padding, output_padding

    Ho = (H - 1) * s - 2 * p + K + op
    Wo = (W - 1) * s - 2 * p + K + op

    d = (K - 1) // s                            # max per-phase row/col tap shift
    Hm = max(H + d, -(-(p + Ho) // s))          # phase-plane rows (covers taps + crop window)
    Wm = max(W + d, -(-(p + Wo) // s))          # phase-plane cols
    L = Hm * Wm + d                             # flattened plane length (+ tap overrun slack)

    # ---- fold BatchNorm (running stats) + conv bias into weight scale / shift ----------
    inv_std = lax.rsqrt(var.astype(jnp.float32) + EPS)
    scale = gamma.astype(jnp.float32) * inv_std                                   # (Cout,)
    shift = (bias.astype(jnp.float32) - mean.astype(jnp.float32)) * scale \
        + beta.astype(jnp.float32)                                                # (Cout,)

    # ConvTranspose2d weight (Cin, Cout, K, K) -> tap-major (K*K*Cout, Cin), BN-scaled, bf16.
    w = jnp.transpose(w_t.astype(jnp.float32), (2, 3, 1, 0))                      # (K,K,Cout,Cin)
    w = w * scale[None, None, :, None]
    w_all = w.reshape(K * K * Cout, Cin).astype(jnp.bfloat16)

    # Shift replicated for each of the s*s stride phases (kernel rows are phase-major).
    shift_col = jnp.tile(shift, s * s).reshape(s * s * Cout, 1)

    # Compact input: NCHW, each row zero-padded W -> Wm, spatial flattened. No zero dilation,
    # no scatter — input DMA is ~4x smaller than streaming the dilated copy.
    x_p = jnp.pad(x_nchw, ((0, 0), (0, 0), (0, 0), (0, Wm - W)))
    x_p = x_p.reshape(N, Cin, H * Wm).astype(jnp.bfloat16)

    kernel = _make_kernel(K, s, Cout, H, Wm)
    out_flat = pl.pallas_call(
        kernel,
        out_shape=jax.ShapeDtypeStruct((N, s * s * Cout, L), jnp.float32),
        grid=(N,),
        in_specs=[
            pl.BlockSpec((1, Cin, H * Wm), lambda n: (n, 0, 0)),
            pl.BlockSpec((K * K * Cout, Cin), lambda n: (0, 0)),   # constant block: no re-fetch
            pl.BlockSpec((s * s * Cout, 1), lambda n: (0, 0)),
        ],
        out_specs=pl.BlockSpec((1, s * s * Cout, L), lambda n: (n, 0, 0)),
        scratch_shapes=[pltpu.VMEM((s * s * Cout, L), jnp.float32)],
        compiler_params=pltpu.CompilerParams(
            dimension_semantics=("parallel",)),
    )(x_p, w_all, shift_col)

    # ---- XLA glue: interleave the s*s phase planes (depth-to-space) and crop padding ----
    out = out_flat[:, :, :Hm * Wm].reshape(N, s, s, Cout, Hm, Wm)
    out = out.transpose(0, 3, 4, 1, 5, 2).reshape(N, Cout, Hm * s, Wm * s)
    return out[:, :, p:p + Ho, p:p + Wo]


def reference(x_nchw, w_t, bias, gamma, beta, mean, var,
              *, stride=2, padding=1, output_padding=0):
    """Pure-JAX f32 reference (ConvTranspose2d via lhs-dilated conv) + BN + ReLU."""
    K = w_t.shape[-1]
    pad = K - 1 - padding
    w_oihw = jnp.flip(jnp.transpose(w_t, (1, 0, 2, 3)), axis=(2, 3))
    conv = lax.conv_general_dilated(
        x_nchw.astype(jnp.float32), w_oihw.astype(jnp.float32),
        window_strides=(1, 1),
        padding=[(pad, pad + output_padding), (pad, pad + output_padding)],
        lhs_dilation=(stride, stride),
        dimension_numbers=('NCHW', 'OIHW', 'NCHW'))
    conv = conv + bias[None, :, None, None]
    inv_std = lax.rsqrt(var + EPS)
    out = ((conv - mean[None, :, None, None]) * inv_std[None, :, None, None]
           * gamma[None, :, None, None] + beta[None, :, None, None])
    return jnp.maximum(out, 0.0)


if __name__ == "__main__":
    key = jax.random.PRNGKey(0)
    N, Cin, H, W = 2, 4, 16, 16
    Cout, K = 8, 3

    k1, k2, k3, k4, k5, k6, k7 = jax.random.split(key, 7)
    x = jax.random.normal(k1, (N, Cin, H, W), jnp.float32)

    # Deterministic parameter init (shapes follow the module's __init__).
    fan = Cin * K * K
    bound = 1.0 / np.sqrt(fan)
    w_t = jax.random.uniform(k2, (Cin, Cout, K, K), jnp.float32, -bound, bound)
    bias = jax.random.uniform(k3, (Cout,), jnp.float32, -bound, bound)
    gamma = 1.0 + 0.1 * jax.random.normal(k4, (Cout,), jnp.float32)
    beta = 0.1 * jax.random.normal(k5, (Cout,), jnp.float32)
    mean = 0.1 * jax.random.normal(k6, (Cout,), jnp.float32)
    var = jnp.abs(1.0 + 0.1 * jax.random.normal(k7, (Cout,), jnp.float32))

    out = deconv_block(x, w_t, bias, gamma, beta, mean, var)
    out = jax.block_until_ready(out)

    assert out.shape == (N, Cout, 2 * H - 1, 2 * W - 1), out.shape
    ref = reference(x, w_t, bias, gamma, beta, mean, var)
    # bf16 matmul inputs (f32 accumulation) vs. an all-f32 reference -> relaxed tolerance.
    np.testing.assert_allclose(np.asarray(out), np.asarray(ref), rtol=2e-2, atol=5e-2)

    print("KERNEL_OK")
</pallas_src>

<mosaic_0001>
module attributes {stable_mosaic.version = 11 : i64} {
  func.func @kernel(%arg0: i32, %arg1: memref<1x4x272xbf16, #tpu.memory_space<vmem>>, %arg2: memref<72x4xbf16, #tpu.memory_space<vmem>>, %arg3: memref<32x1xf32, #tpu.memory_space<vmem>>, %arg4: memref<1x32x290xf32, #tpu.memory_space<vmem>>, %arg5: memref<32x290xf32, #tpu.memory_space<vmem>>) attributes {dimension_semantics = [#tpu.dimension_semantics<parallel>], iteration_bounds = array<i64: 2>, scalar_prefetch = 0 : i64, scratch_operands = 1 : i64, tpu.core_type = #tpu.core_type<tc>, window_params = [{transform_indices = @transform_0, window_bounds = array<i64: 1, 4, 272>}, {pipeline_mode = #tpu.pipeline_mode<synchronous>, transform_indices = @transform_1, window_bounds = array<i64: 72, 4>}, {pipeline_mode = #tpu.pipeline_mode<synchronous>, transform_indices = @transform_2, window_bounds = array<i64: 32, 1>}, {transform_indices = @transform_3, window_bounds = array<i64: 1, 32, 290>}]} {
    %c0 = arith.constant 0 : index
    %c0_0 = arith.constant 0 : index
    %0 = vector.load %arg2[%c0, %c0_0] : memref<72x4xbf16, #tpu.memory_space<vmem>>, vector<72x4xbf16>
    %c0_1 = arith.constant 0 : index
    %c0_2 = arith.constant 0 : index
    %c0_3 = arith.constant 0 : index
    %1 = vector.load %arg1[%c0_1, %c0_2, %c0_3] : memref<1x4x272xbf16, #tpu.memory_space<vmem>>, vector<1x4x272xbf16>
    %2 = vector.shape_cast %1 : vector<1x4x272xbf16> to vector<4x272xbf16>
    %cst = arith.constant dense<0.000000e+00> : vector<72x272xf32>
    %3 = tpu.matmul %0, %2, %cst {dimension_numbers = #tpu.dot_dimension_numbers<[1], [0], [0], [1], [0, 0, 1, 1], [], []>} : vector<72x4xbf16>, vector<4x272xbf16>, vector<72x272xf32> -> vector<72x272xf32>
    %cst_4 = arith.constant 0.000000e+00 : f32
    %4 = vector.broadcast %cst_4 : f32 to vector<32x290xf32>
    %c0_5 = arith.constant 0 : index
    %c0_6 = arith.constant 0 : index
    %5 = vector.load %arg5[%c0_5, %c0_6] : memref<32x290xf32, #tpu.memory_space<vmem>>, vector<32x290xf32>
    tpu.vector_store %arg5[%c0_5, %c0_6], %4 {strides = array<i32>} : memref<32x290xf32, #tpu.memory_space<vmem>>, vector<32x290xf32>,
    %c0_7 = arith.constant 0 : index
    %c0_8 = arith.constant 0 : index
    %6 = vector.load %arg5[%c0_7, %c0_8] : memref<32x290xf32, #tpu.memory_space<vmem>>, vector<8x272xf32>
    %7 = vector.extract_strided_slice %3 {offsets = [0, 0], sizes = [8, 272], strides = [1, 1]} : vector<72x272xf32> to vector<8x272xf32>
    %8 = arith.addf %6, %7 : vector<8x272xf32>
    %c0_9 = arith.constant 0 : index
    %c0_10 = arith.constant 0 : index
    %9 = vector.load %arg5[%c0_9, %c0_10] : memref<32x290xf32, #tpu.memory_space<vmem>>, vector<8x272xf32>
    tpu.vector_store %arg5[%c0_9, %c0_10], %8 {strides = array<i32>} : memref<32x290xf32, #tpu.memory_space<vmem>>, vector<8x272xf32>,
    %c8 = arith.constant 8 : index
    %c0_11 = arith.constant 0 : index
    %10 = vector.load %arg5[%c8, %c0_11] : memref<32x290xf32, #tpu.memory_space<vmem>>, vector<8x272xf32>
    %11 = vector.extract_strided_slice %3 {offsets = [8, 0], sizes = [8, 272], strides = [1, 1]} : vector<72x272xf32> to vector<8x272xf32>
    %12 = arith.addf %10, %11 : vector<8x272xf32>
    %c8_12 = arith.constant 8 : index
    %c0_13 = arith.constant 0 : index
    %13 = vector.load %arg5[%c8_12, %c0_13] : memref<32x290xf32, #tpu.memory_space<vmem>>, vector<8x272xf32>
    tpu.vector_store %arg5[%c8_12, %c0_13], %12 {strides = array<i32>} : memref<32x290xf32, #tpu.memory_space<vmem>>, vector<8x272xf32>,
    %c0_14 = arith.constant 0 : index
    %c1 = arith.constant 1 : index
    %14 = vector.load %arg5[%c0_14, %c1] : memref<32x290xf32, #tpu.memory_space<vmem>>, vector<8x272xf32>
    %15 = vector.extract_strided_slice %3 {offsets = [16, 0], sizes = [8, 272], strides = [1, 1]} : vector<72x272xf32> to vector<8x272xf32>
    %16 = arith.addf %14, %15 : vector<8x272xf32>
    %c0_15 = arith.constant 0 : index
    %c1_16 = arith.constant 1 : index
    %17 = vector.load %arg5[%c0_15, %c1_16] : memref<32x290xf32, #tpu.memory_space<vmem>>, vector<8x272xf32>
    tpu.vector_store %arg5[%c0_15, %c1_16], %16 {strides = array<i32>} : memref<32x290xf32, #tpu.memory_space<vmem>>, vector<8x272xf32>,
    %c16 = arith.constant 16 : index
    %c0_17 = arith.constant 0 : index
    %18 = vector.load %arg5[%c16, %c0_17] : memref<32x290xf32, #tpu.memory_space<vmem>>, vector<8x272xf32>
    %19 = vector.extract_strided_slice %3 {offsets = [24, 0], sizes = [8, 272], strides = [1, 1]} : vector<72x272xf32> to vector<8x272xf32>
    %20 = arith.addf %18, %19 : vector<8x272xf32>
    %c16_18 = arith.constant 16 : index
    %c0_19 = arith.constant 0 : index
    %21 = vector.load %arg5[%c16_18, %c0_19] : memref<32x290xf32, #tpu.memory_space<vmem>>, vector<8x272xf32>
    tpu.vector_store %arg5[%c16_18, %c0_19], %20 {strides = array<i32>} : memref<32x290xf32, #tpu.memory_space<vmem>>, vector<8x272xf32>,
    %c24 = arith.constant 24 : index
    %c0_20 = arith.constant 0 : index
    %22 = vector.load %arg5[%c24, %c0_20] : memref<32x290xf32, #tpu.memory_space<vmem>>, vector<8x272xf32>
    %23 = vector.extract_strided_slice %3 {offsets = [32, 0], sizes = [8, 272], strides = [1, 1]} : vector<72x272xf32> to vector<8x272xf32>
    %24 = arith.addf %22, %23 : vector<8x272xf32>
    %c24_21 = arith.constant 24 : index
    %c0_22 = arith.constant 0 : index
    %25 = vector.load %arg5[%c24_21, %c0_22] : memref<32x290xf32, #tpu.memory_space<vmem>>, vector<8x272xf32>
    tpu.vector_store %arg5[%c24_21, %c0_22], %24 {strides = array<i32>} : memref<32x290xf32, #tpu.memory_space<vmem>>, vector<8x272xf32>,
    %c16_23 = arith.constant 16 : index
    %c1_24 = arith.constant 1 : index
    %26 = vector.load %arg5[%c16_23, %c1_24] : memref<32x290xf32, #tpu.memory_space<vmem>>, vector<8x272xf32>
    %27 = vector.extract_strided_slice %3 {offsets = [40, 0], sizes = [8, 272], strides = [1, 1]} : vector<72x272xf32> to vector<8x272xf32>
    %28 = arith.addf %26, %27 : vector<8x272xf32>
    %c16_25 = arith.constant 16 : index
    %c1_26 = arith.constant 1 : index
    %29 = vector.load %arg5[%c16_25, %c1_26] : memref<32x290xf32, #tpu.memory_space<vmem>>, vector<8x272xf32>
    tpu.vector_store %arg5[%c16_25, %c1_26], %28 {strides = array<i32>} : memref<32x290xf32, #tpu.memory_space<vmem>>, vector<8x272xf32>,
    %c0_27 = arith.constant 0 : index
    %c17 = arith.constant 17 : index
    %30 = vector.load %arg5[%c0_27, %c17] : memref<32x290xf32, #tpu.memory_space<vmem>>, vector<8x272xf32>
    %31 = vector.extract_strided_slice %3 {offsets = [48, 0], sizes = [8, 272], strides = [1, 1]} : vector<72x272xf32> to vector<8x272xf32>
    %32 = arith.addf %30, %31 : vector<8x272xf32>
    %c0_28 = arith.constant 0 : index
    %c17_29 = arith.constant 17 : index
    %33 = vector.load %arg5[%c0_28, %c17_29] : memref<32x290xf32, #tpu.memory_space<vmem>>, vector<8x272xf32>
    tpu.vector_store %arg5[%c0_28, %c17_29], %32 {strides = array<i32>} : memref<32x290xf32, #tpu.memory_space<vmem>>, vector<8x272xf32>,
    %c8_30 = arith.constant 8 : index
    %c17_31 = arith.constant 17 : index
    %34 = vector.load %arg5[%c8_30, %c17_31] : memref<32x290xf32, #tpu.memory_space<vmem>>, vector<8x272xf32>
    %35 = vector.extract_strided_slice %3 {offsets = [56, 0], sizes = [8, 272], strides = [1, 1]} : vector<72x272xf32> to vector<8x272xf32>
    %36 = arith.addf %34, %35 : vector<8x272xf32>
    %c8_32 = arith.constant 8 : index
    %c17_33 = arith.constant 17 : index
    %37 = vector.load %arg5[%c8_32, %c17_33] : memref<32x290xf32, #tpu.memory_space<vmem>>, vector<8x272xf32>
    tpu.vector_store %arg5[%c8_32, %c17_33], %36 {strides = array<i32>} : memref<32x290xf32, #tpu.memory_space<vmem>>, vector<8x272xf32>,
    %c0_34 = arith.constant 0 : index
    %c18 = arith.constant 18 : index
    %38 = vector.load %arg5[%c0_34, %c18] : memref<32x290xf32, #tpu.memory_space<vmem>>, vector<8x272xf32>
    %39 = vector.extract_strided_slice %3 {offsets = [64, 0], sizes = [8, 272], strides = [1, 1]} : vector<72x272xf32> to vector<8x272xf32>
    %40 = arith.addf %38, %39 : vector<8x272xf32>
    %c0_35 = arith.constant 0 : index
    %c18_36 = arith.constant 18 : index
    %41 = vector.load %arg5[%c0_35, %c18_36] : memref<32x290xf32, #tpu.memory_space<vmem>>, vector<8x272xf32>
    tpu.vector_store %arg5[%c0_35, %c18_36], %40 {strides = array<i32>} : memref<32x290xf32, #tpu.memory_space<vmem>>, vector<8x272xf32>,
    %c0_37 = arith.constant 0 : index
    %c0_38 = arith.constant 0 : index
    %42 = vector.load %arg5[%c0_37, %c0_38] : memref<32x290xf32, #tpu.memory_space<vmem>>, vector<32x290xf32>
    %c0_39 = arith.constant 0 : index
    %c0_40 = arith.constant 0 : index
    %43 = vector.load %arg3[%c0_39, %c0_40] : memref<32x1xf32, #tpu.memory_space<vmem>>, vector<32x1xf32>
    %44 = vector.broadcast %43 : vector<32x1xf32> to vector<32x290xf32>
    %45 = arith.addf %42, %44 : vector<32x290xf32>
    %cst_41 = arith.constant 0.000000e+00 : f32
    %46 = vector.broadcast %cst_41 : f32 to vector<32x290xf32>
    %47 = arith.maximumf %45, %46 : vector<32x290xf32>
    %c0_42 = arith.constant 0 : index
    %c0_43 = arith.constant 0 : index
    %c0_44 = arith.constant 0 : index
    %48 = vector.load %arg4[%c0_42, %c0_43, %c0_44] : memref<1x32x290xf32, #tpu.memory_space<vmem>>, vector<1x32x290xf32>
    %49 = vector.shape_cast %48 : vector<1x32x290xf32> to vector<32x290xf32>
    %50 = vector.shape_cast %47 : vector<32x290xf32> to vector<1x32x290xf32>
    tpu.vector_store %arg4[%c0_42, %c0_43, %c0_44], %50 {strides = array<i32>} : memref<1x32x290xf32, #tpu.memory_space<vmem>>, vector<1x32x290xf32>,
    return
  }
  func.func @transform_0(%arg0: i32) -> (i32, i32, i32) {
    %c0_i32 = arith.constant 0 : i32
    %c0_i32_0 = arith.constant 0 : i32
    %c0_i32_1 = arith.constant 0 : i32
    return %arg0, %c0_i32, %c0_i32_0 : i32, i32, i32
  }
  func.func @transform_1(%arg0: i32) -> (i32, i32) {
    %c0_i32 = arith.constant 0 : i32
    %c0_i32_0 = arith.constant 0 : i32
    %c0_i32_1 = arith.constant 0 : i32
    return %c0_i32, %c0_i32_0 : i32, i32
  }
  func.func @transform_2(%arg0: i32) -> (i32, i32) {
    %c0_i32 = arith.constant 0 : i32
    %c0_i32_0 = arith.constant 0 : i32
    %c0_i32_1 = arith.constant 0 : i32
    return %c0_i32, %c0_i32_0 : i32, i32
  }
  func.func @transform_3(%arg0: i32) -> (i32, i32, i32) {
    %c0_i32 = arith.constant 0 : i32
    %c0_i32_0 = arith.constant 0 : i32
    %c0_i32_1 = arith.constant 0 : i32
    return %arg0, %c0_i32, %c0_i32_0 : i32, i32, i32
  }
}

</mosaic_0001>

<bundles_post_ra>
// kernel: tpu_custom_call.1
= control target key start
LH: loop header
LB: loop body
LE: loop exit
PB: predicated region body
PF: predicated region fallthrough
CT: control target
= control target key end

     0   :  { %8 = vsyncpa [#allocation4], 0  ;;  %s1151_s0 = inlined_call_operand.vmem [shape: bf16[2,4,272], index: 0, kind: input, shape index: {}]   ;;  %s1152_s1 = inlined_call_operand.vmem [shape: bf16[72,4], index: 1, kind: input, shape index: {}]   ;;  %s1153_s2 = inlined_call_operand.vmem [shape: f32[32,1], index: 2, kind: input, shape index: {}]   ;;  %s1154_s3 = inlined_call_operand.hbm [shape: f32[2,32,290], index: 3, kind: output, shape index: {}]  }
   0x1   :  { %10 = vsyncpa [#allocation4 + $0x1], 0  ;;  %s924_s12 = smov 0   ;;  %s926_s13 = smov 0  }
   0x2   :  { %s928_s14 = smov 0   ;;  %s930_s15 = smov 0  }
   0x3 LB: > { %s945_s16 = sadd.s32 4294967295, %s892_s15   ;;  %s719_s17 = sadd.s32 4294967294, %s892_s15   ;;  %s892_s15 = sphi %s930_s15, %s1160_s15   ;;  %s888_s14 = sphi %s928_s14, %s1159_s14   ;;  %s884_s13 = sphi %s926_s13, %s1158_s13   ;;  %s880_s12 = sphi %s924_s12, %s1157_s12  }
   0x4   : > { %s949_s18 = sadd.s32 1, %s892_s15   ;;  %s91_s19 = sadd.s32 1, %s888_s14 }
   0x5   : > { %s88_s20 = ssub.s32 %s892_s15, %s949_s18  ;;  %p101_p0 = scmp.ne.s32.totalorder %s888_s14, %s884_s13 }
   0x6   : > { %p89_p1 = scmp.eq.s32.totalorder %s88_s20, 0  ;;  %p102_p2 = scmp.eq.s32.totalorder %s945_s16, 1 }
   0x7   : > { %p107_p3 = scmp.ne.s32.totalorder %s884_s13, %s880_s12  ;;  %p108_p4 = scmp.eq.s32.totalorder %s719_s17, 1 }
   0x8   : > { %s960_s21 = scalar_select %p89_p1, %s888_s14, %s91_s19  }
   0x9   : > { %p962_p5 = por %p102_p2, %p101_p0  ;;  %p966_p6 = por %p108_p4, %p107_p3 }
   0xa   : > { %p722_p7 = scmp.ge.s32.totalorder %s892_s15, 1  ;;  %p140_p8 = scmp.lt.s32.totalorder %s892_s15, 3 }
   0xc   : > { %p141_p9 = pnand %p722_p7, %p140_p8 }
   0xd   : > { %p164_p10 = scmp.lt.s32.totalorder (!%p141_p9), %s945_s16, 1  ;;  %v208_v0 = vlaneseq (!%p141_p9)  ;;  %v894_v1 = vmov (!%p141_p9), 1983009808   ;;  %v895_v3 = vmov (!%p141_p9), 0.0   ;;  %v896_v5 = vmov (!%p141_p9), 0   ;;  %v583_v8 = vld [vmem:[%s1153_s2] sm:$0xff] (!%p141_p9) }
   0xe   : > { %144 = sbr.rel (%p141_p9) target bundleno = 450 (0x1c2), region = 32  ;;  %v206_v2 = vunpack.c.l.s4 (!%p141_p9), %v894_v1  ;;  %749 = vmatprep.subr.bf16.mxu1 (!%p141_p9), %v895_v3  ;;  %278 = vmatprep.mubr.bf16.mxu0 (!%p141_p9), %v896_v5  ;;  %vm897_vm0 = vmmov (!%p141_p9), 0   ;;  %vm236_vm1 = vcmask (!%p141_p9), 1041408   ;;  %v825_v16 = vld [vmem:[%s1152_s1] sm:$0xff] (!%p141_p9)   ;;  %vm220_vm2 = vcmask (!%p141_p9), 31744   ;;  %v826_v17 = vld [vmem:[%s1152_s1 + $0x8] sm:$0xff] (!%p141_p9)  }
   0xf   : > { %v209_v4 = vshrl.u32 (!%p141_p9), %v208_v0, 7  ;;  %822 = vset.pattern.permute.xlu1 (!%p141_p9), %v896_v5  ;;  %751 = vmatprep.mubr.msk.bf16.mxu1 (!%p141_p9), %vm897_vm0, %v895_v3  ;;  %v827_v18 = vld [vmem:[%s1152_s1 + $0x10] sm:$0xff] (!%p141_p9)   ;;  %v828_v19 = vld [vmem:[%s1152_s1 + $0x18] sm:$0xff] (!%p141_p9)   ;;  %v829_v20 = vld [vmem:[%s1152_s1 + $0x20] ss:$0 sps:$4 sm:$0xff] (!%p141_p9)   ;;  %vm401_vm3 = vcmask (!%p141_p9), 277504  }
  0x10   : > { %v207_v6 = vunpack.c.0.s8 (!%p141_p9), %v206_v2  ;;  %823 = vset.pattern.permute.xlu0 (!%p141_p9), %v896_v5  ;;  %589 = vperm.xlu1 (!%p141_p9), %822, %v583_v8   ;;  %402 = vst.msk [vmem:[#allocation2 + $0x10] sm:$0xff] (!%p141_p9), %vm401_vm3, %v895_v3  ;;  %405 = vst.msk [vmem:[#allocation2 + $0x28] sm:$0xff] (!%p141_p9), %vm401_vm3, %v895_v3  ;;  %vm420_vm4 = vcmask (!%p141_p9), 130048   ;;  %s898_s20 = smov (!%p141_p9), 1   ;;  %vm452_vm5 = vcmask (!%p141_p9), 1047560   ;;  %vm443_vm6 = vcmask (!%p141_p9), 7168  }
  0x11   : > { %408 = vst.msk [vmem:[#allocation2 + $0x40] sm:$0xff] (!%p141_p9), %vm401_vm3, %v895_v3  ;;  %411 = vst.msk [vmem:[#allocation2 + $0x58] sm:$0xff] (!%p141_p9), %vm401_vm3, %v895_v3  ;;  %vm455_vm7 = vcmask (!%p141_p9), 138240   ;;  %vm518_vm8 = vcmask (!%p141_p9), 1047688   ;;  %vm521_vm9 = vcmask (!%p141_p9), 269312   ;;  %vm567_vm10 = vcmask (!%p141_p9), 1047696  }
  0x12   : > { %v210_v7 = vsub.s32 (!%p141_p9), %v207_v6, %v209_v4  ;;  %v584_v6 = vld [vmem:[%s1153_s2 + $0x8] sm:$0xff] (!%p141_p9)  ;;  %s161_s5 = sand.u32 (!%p141_p9), 1, %s884_s13   ;;  %vm558_vm11 = vcmask (!%p141_p9), 146432   ;;  %s773_s8 = smul.u32 (!%p141_p9), 1536, %s945_s16 }
  0x13   : > { %s771_s6 = smul.u32 (!%p141_p9), 96, %s161_s5  ;;  %s1110_s19 = scalar_lea.sflag (!%p141_p9), [#allocation4], %s161_s5 }
  0x14   : > { %s1102_s17 = scalar_lea.hbm (!%p141_p9), %s1154_s3, %s773_s8 }
  0x15   : > { %s165_s24 = scalar_select %p164_p10, %s945_s16, 1 }
  0x16   : > { %s1071_s7 = scalar_lea.vmem [#allocation3], %s771_s6 }
  0x17   : > { %s772_s25 = smul.u32 6, %s165_s24  ;;  %v414_v21 = vld [vmem:[#allocation2 + $0x10] sm:$0xff]  ;;  %v424_v24 = vld [vmem:[#allocation2 + $0x28] sm:$0xff]  ;;  %s899_s24 = smov 17  }
  0x18   : > { %v459_v35 = vld [vmem:[#allocation2 + $0x40] sm:$0xff]  ;;  %v468_v43 = vld [vmem:[#allocation2 + $0x58] sm:$0xff]  ;;  %s657_s9 = sshll.u32 %s1071_s7, 4  ;;  %s1104_s9 = int_to_ptr.vmem [resolvable:$true] %s657_s9 }
  0x19   : > { %s168_s28 = scalar_lea.vmem %s1151_s0, %s772_s25  ;;  %s900_s25 = smov 18  }
  0x1a   : > { %v179_v9 = vld [vmem:[%s168_s28] sm:$0x3f]  ;;  %s830_s16 = scalar_lea.vmem %s1104_s9, 1536 }
  0x1b   : > { %v211_v10 = vrot.slane %v179_v9, %v210_v7  ;;  %v204_v11 = vcombine.high %v179_v9, %v179_v9  ;;  %p831_p11 = scmp.ne.s32.totalorder %s1104_s9, %s830_s16 }
  0x1d   : > { %v219_v12 = vcombine.high %v211_v10, %v211_v10  ;;  %v238_v13 = vsel %vm236_vm1, %v211_v10, 0  ;;  %v218_v14 = vrot.slane %v204_v11, %v210_v7  ;;  %v586_v7 = vld [vmem:[%s1153_s2 + $0x18] sm:$0xff]  ;;  %p832_p12 = pnand %p831_p11, %p962_p5 }
  0x1f   : > { %729 = vmatprep.subr.msk.bf16.mxu0 %vm236_vm1, %v219_v12  ;;  %v244_v15 = vsel %vm236_vm1, %v218_v14, 0  ;;  %p833_p13 = pneg %p832_p12 }
  0x20   : > { %247 = vmatpush1.bf16.msra.mxu0 %v238_v13  ;;  %750 = vmatpush3.bf16.msra.mxu1 %v244_v15 }
  0x23   : > { %730 = vmatmul.mubr.msk.bf16.vlgmr.msra.gmra.mrb[0].mxu0 %vm220_vm2, %v825_v16  ;;  %752 = vmatmul.mubr.msk.bf16.vlgmr.msra.gmra.mrb[0].mxu1 %vm220_vm2, %v825_v16 }
  0x24   : > { %288 = vmatprep.mubr.bf16.mxu0 %v896_v5  ;;  %755 = vmatprep.mubr.msk.bf16.mxu1 %vm897_vm0, %v895_v3 }
  0x2b   : > { %731 = vmatmul.mubr.msk.bf16.gmra.mrb[4].mxu0 %vm220_vm2, %v826_v17  ;;  %756 = vmatmul.mubr.msk.bf16.gmra.mrb[4].mxu1 %vm220_vm2, %v826_v17 }
  0x2c   : > { %298 = vmatprep.mubr.bf16.mxu0 %v896_v5  ;;  %759 = vmatprep.mubr.msk.bf16.mxu1 %vm897_vm0, %v895_v3 }
  0x33   : > { %732 = vmatmul.mubr.msk.bf16.gmra.mrb[8].mxu0 %vm220_vm2, %v827_v18  ;;  %760 = vmatmul.mubr.msk.bf16.gmra.mrb[8].mxu1 %vm220_vm2, %v827_v18 }
  0x34   : > { %308 = vmatprep.mubr.bf16.mxu0 %v896_v5  ;;  %763 = vmatprep.mubr.msk.bf16.mxu1 %vm897_vm0, %v895_v3 }
  0x3b   : > { %733 = vmatmul.mubr.msk.bf16.gmra.mrb[12].mxu0 %vm220_vm2, %v828_v19  ;;  %764 = vmatmul.mubr.msk.bf16.gmra.mrb[12].mxu1 %vm220_vm2, %v828_v19 }
  0x3c   : > { %318 = vmatprep.mubr.bf16.mxu0 %v896_v5  ;;  %767 = vmatprep.mubr.msk.bf16.mxu1 %vm897_vm0, %v895_v3  ;;  %v585_v5 = vld [vmem:[%s1153_s2 + $0x10] sm:$0xff] }
  0x43   : > { %734 = vmatmul.mubr.msk.bf16.gmra.mrb[16].mxu0 %vm220_vm2, %v829_v20  ;;  %768 = vmatmul.mubr.msk.bf16.gmra.mrb[16].mxu1 %vm220_vm2, %v829_v20 }
  0x8f   : > { %v1046_v8 = vpop.permute.xlu1 %589 }
  0xf6   : > { %v1014_v22 = vpop.f32.mrb[0].mxu0  ;;  %v361_v23 = vpop.f32.mrb[0].mxu1 }
  0xf7   : > { %v1016_v25 = vpop.f32.mrb[1].mxu0  ;;  %v417_v26 = vadd.f32 %v414_v21, %v361_v23  ;;  %v753_v27 = vpop.f32.mrb[1].mxu1  ;;  %418 = vst [vmem:[#allocation2] sm:$0xff] %v1014_v22 }
  0xf8   : > { %v1018_v28 = vpop.f32.mrb[2].mxu0  ;;  %v364_v29 = vpop.f32.mrb[2].mxu1 }
  0xf9   : > { %421 = vst.msk [vmem:[#allocation2 + $0x10] sm:$0xff] %vm420_vm4, %v417_v26  ;;  %v1022_v30 = vpop.f32.mrb[3].mxu0  ;;  %v427_v31 = vadd.f32 %v424_v24, %v364_v29  ;;  %v754_v32 = vpop.f32.mrb[3].mxu1  ;;  %428 = vst [vmem:[#allocation2 + $0x18] sm:$0xff] %v1018_v28 }
  0xfb   : > { %430 = vst.msk [vmem:[#allocation2 + $0x28] sm:$0xff] %vm420_vm4, %v427_v31 }
  0xfe   : > { %v290_v33 = vpop.f32.mrb[4].mxu0  ;;  %v369_v34 = vpop.f32.mrb[4].mxu1 }
  0xff   : > { %437 = vrot.lane.b32.xlu0 %v290_v33, %s898_s20  ;;  %v292_v36 = vpop.f32.mrb[5].mxu0  ;;  %v757_v37 = vpop.f32.mrb[5].mxu1  ;;  %441 = vrot.lane.b32.xlu1 %v369_v34, %s898_s20 }
 0x100   : > { %v1026_v38 = vpop.f32.mrb[6].mxu0  ;;  %v372_v39 = vpop.f32.mrb[6].mxu1  ;;  %v433_v13 = vld [vmem:[#allocation2 + $0x10] sm:$0xff] }
 0x101   : > { %v1028_v40 = vpop.f32.mrb[7].mxu0  ;;  %v462_v41 = vadd.f32 %v459_v35, %v372_v39  ;;  %v758_v42 = vpop.f32.mrb[7].mxu1  ;;  %463 = vst [vmem:[#allocation2 + $0x30] sm:$0xff] %v1026_v38 }
 0x103   : > { %465 = vst.msk [vmem:[#allocation2 + $0x40] sm:$0xff] %vm420_vm4, %v462_v41  ;;  %439 = vrot.lane.b32.xlu0 %v292_v36, %s898_s20 }
 0x106   : > { %v1032_v44 = vpop.f32.mrb[8].mxu0  ;;  %v377_v45 = vpop.f32.mrb[8].mxu1 }
 0x107   : > { %v1034_v46 = vpop.f32.mrb[9].mxu0  ;;  %v471_v47 = vadd.f32 %v468_v43, %v377_v45  ;;  %v761_v48 = vpop.f32.mrb[9].mxu1 }
 0x108   : > { %v304_v49 = vpop.f32.mrb[10].mxu0  ;;  %v380_v50 = vpop.f32.mrb[10].mxu1 }
 0x109   : > { %474 = vst.msk [vmem:[#allocation2 + $0x58] sm:$0xff] %vm420_vm4, %v471_v47  ;;  %481 = vrot.lane.b32.xlu0 %v304_v49, %s898_s20  ;;  %v306_v51 = vpop.f32.mrb[11].mxu0  ;;  %v762_v52 = vpop.f32.mrb[11].mxu1  ;;  %v525_v47 = vld [vmem:[#allocation2 + $0x28] sm:$0xff] }
 0x10a   : > { %483 = vrot.lane.b32.xlu1 %v306_v51, %s898_s20 }
 0x10d   : > { %485 = vrot.lane.b32.xlu0 %v380_v50, %s898_s20  ;;  %s901_s20 = smov [#allocation3]  }
 0x10e   : > { %v310_v53 = vpop.f32.mrb[12].mxu0  ;;  %v385_v54 = vpop.f32.mrb[12].mxu1 }
 0x10f   : > { %v312_v55 = vpop.f32.mrb[13].mxu0  ;;  %504 = vrot.lane.b32.xlu1 %v310_v53, %s899_s24  ;;  %v765_v56 = vpop.f32.mrb[13].mxu1 }
 0x110   : > { %v314_v57 = vpop.f32.mrb[14].mxu0  ;;  %v388_v58 = vpop.f32.mrb[14].mxu1 }
 0x111   : > { %v316_v59 = vpop.f32.mrb[15].mxu0  ;;  %506 = vrot.lane.b32.xlu0 %v312_v55, %s899_s24  ;;  %v766_v60 = vpop.f32.mrb[15].mxu1 }
 0x113   : > { %508 = vrot.lane.b32.xlu1 %v385_v54, %s899_s24 }
 0x115   : > { %531 = vrot.lane.b32.xlu0 %v316_v59, %s899_s24 }
 0x116   : > { %v320_v61 = vpop.f32.mrb[16].mxu0  ;;  %v393_v62 = vpop.f32.mrb[16].mxu1 }
 0x117   : > { %529 = vrot.lane.b32.xlu1 %v314_v57, %s899_s24  ;;  %v322_v63 = vpop.f32.mrb[17].mxu0  ;;  %v769_v0 = vpop.f32.mrb[17].mxu1 }
 0x118   : > { %v324_v1 = vpop.f32.mrb[18].mxu0  ;;  %v396_v2 = vpop.f32.mrb[18].mxu1 }
 0x119   : > { %552 = vrot.lane.b32.xlu0 %v320_v61, %s900_s25  ;;  %v325_v3 = vpop.f32.mrb[19].mxu0  ;;  %v770_v4 = vpop.f32.mrb[19].mxu1 }
 0x11b   : > { %533 = vrot.lane.b32.xlu1 %v388_v58, %s899_s24  ;;  %s834_s24 = sshll.u32 %s901_s20, 4  ;;  %s835_s24 = int_to_ptr.vmem [resolvable:$false] %s834_s24 }
 0x11c   : > { %p837_p0 = scmp.lt.s32.totalorder %s1104_s9, %s835_s24 }
 0x11d   : > { %556 = vrot.lane.b32.xlu0 %v393_v62, %s900_s25 }
 0x11f   : > { %599 = vperm.xlu1 %822, %v585_v5  }
 0x121   : > { %594 = vperm.xlu0 %823, %v584_v6  }
 0x123   : > { %554 = vrot.lane.b32.xlu1 %v322_v63, %s900_s25  ;;  %s836_s25 = scalar_lea.vmem %s835_s24, 3072 }
 0x124   : > { %p838_p1 = scmp.lt.s32.totalorder %s836_s25, %s830_s16 }
 0x126   : > { %p839_p2 = por %p838_p1, %p837_p0 }
 0x127   : > { %604 = vperm.xlu1 %822, %v586_v7  }
 0x128   : > { %p840_p3 = pnand %p839_p2, %p833_p13 }
 0x171   : > { %v438_v9 = vpop.permute.xlu0 %437  ;;  %v442_v11 = vpop.permute.xlu1 %441 }
 0x172   : > { %v449_v10 = vadd.f32 %v438_v9, %v1014_v22  ;;  %v477_v22 = vld [vmem:[#allocation2 + $0x40] sm:$0xff] }
 0x174   : > { %453 = vst.msk [vmem:[#allocation2] sm:$0xff] %vm452_vm5, %v449_v10 }
 0x175   : > { %v440_v12 = vpop.permute.xlu0 %439 }
 0x176   : > { %v445_v14 = vsel %vm443_vm6, %v440_v12, %v442_v11  ;;  %v444_v52 = vsel %vm443_vm6, %v438_v9, %v440_v12 }
 0x177   : > { %v451_v15 = vadd.f32 %v445_v14, %v433_v13  ;;  %v450_v60 = vadd.f32 %v444_v52, %v1016_v25 }
 0x179   : > { %456 = vst.msk [vmem:[#allocation2 + $0x10] sm:$0xff] %vm455_vm7, %v451_v15 }
 0x17b   : > { %v482_v16 = vpop.permute.xlu0 %481  ;;  %v498_v26 = vld [vmem:[#allocation2] sm:$0xff] }
 0x17c   : > { %v492_v17 = vadd.f32 %v482_v16, %v1026_v38  ;;  %v484_v18 = vpop.permute.xlu1 %483 }
 0x17d   : > { %v487_v19 = vsel %vm443_vm6, %v482_v16, %v484_v18 }
 0x17e   : > { %495 = vst.msk [vmem:[#allocation2 + $0x30] sm:$0xff] %vm452_vm5, %v492_v17  ;;  %v493_v20 = vadd.f32 %v487_v19, %v1028_v40  ;;  %v582_v17 = vld [vmem:[#allocation2 + $0x58] sm:$0xff] }
 0x17f   : > { %v486_v21 = vpop.permute.xlu0 %485 }
 0x180   : > { %v488_v23 = vsel %vm443_vm6, %v484_v18, %v486_v21  ;;  %v500_v33 = vld [vmem:[#allocation2 + $0x10] sm:$0xff] }
 0x181   : > { %v494_v24 = vadd.f32 %v488_v23, %v477_v22  ;;  %v505_v27 = vpop.permute.xlu1 %504 }
 0x182   : > { %v515_v29 = vadd.f32 %v505_v27, %v498_v26 }
 0x183   : > { %497 = vst.msk [vmem:[#allocation2 + $0x40] sm:$0xff] %vm455_vm7, %v494_v24  ;;  %v507_v31 = vpop.permute.xlu0 %506 }
 0x184   : > { %519 = vst.msk [vmem:[#allocation2] sm:$0xff] %vm518_vm8, %v515_v29  ;;  %v510_v56 = vsel %vm455_vm7, %v505_v27, %v507_v31 }
 0x185   : > { %v509_v32 = vpop.permute.xlu1 %508  ;;  %v577_v53 = vld [vmem:[#allocation2 + $0x30] sm:$0xff]  ;;  %v516_v4 = vadd.f32 %v510_v56, %v450_v60 }
 0x186   : > { %v511_v34 = vsel %vm455_vm7, %v507_v31, %v509_v32 }
 0x187   : > { %v517_v35 = vadd.f32 %v511_v34, %v500_v33  ;;  %v532_v36 = vpop.permute.xlu0 %531 }
 0x189   : > { %522 = vst.msk [vmem:[#allocation2 + $0x10] sm:$0xff] %vm521_vm9, %v517_v35  ;;  %v530_v37 = vpop.permute.xlu1 %529 }
 0x18a   : > { %v535_v38 = vsel %vm455_vm7, %v530_v37, %v532_v36  ;;  %v540_v39 = vadd.f32 %v530_v37, %v1018_v28  ;;  %v579_v54 = vld [vmem:[#allocation2 + $0x40] sm:$0xff] }
 0x18b   : > { %v541_v40 = vadd.f32 %v535_v38, %v1022_v30  ;;  %v546_v41 = vld [vmem:[#allocation2] sm:$0xff]  ;;  %v553_v42 = vpop.permute.xlu0 %552 }
 0x18c   : > { %543 = vst.msk [vmem:[#allocation2 + $0x18] sm:$0xff] %vm518_vm8, %v540_v39  ;;  %v564_v43 = vadd.f32 %v553_v42, %v546_v41 }
 0x18d   : > { %v534_v45 = vpop.permute.xlu1 %533 }
 0x18e   : > { %568 = vst.msk [vmem:[#allocation2] sm:$0xff] %vm567_vm10, %v564_v43  ;;  %v536_v48 = vsel %vm455_vm7, %v532_v36, %v534_v45 }
 0x18f   : > { %v542_v49 = vadd.f32 %v536_v48, %v525_v47  ;;  %v557_v51 = vpop.permute.xlu0 %556 }
 0x190   : > { %v548_v9 = vld [vmem:[#allocation2 + $0x10] sm:$0xff] }
 0x191   : > { %545 = vst.msk [vmem:[#allocation2 + $0x28] sm:$0xff] %vm521_vm9, %v542_v49 }
 0x193   : > { %v574_v61 = vld [vmem:[#allocation2 + $0x18] sm:$0xff] }
 0x195   : > { %v571_v28 = vld [vmem:[#allocation2] sm:$0xff] }
 0x196   : > { %v607_v30 = vadd.f32 %v1046_v8, %v571_v28 }
 0x198   : > { %v619_v50 = vmax.f32 %v607_v30, 0.0  ;;  %v576_v2 = vld [vmem:[#allocation2 + $0x28] sm:$0xff] }
 0x19a   : > { %631 = vst [vmem:[%s1071_s7] sm:$0xff] %v619_v50 }
 0x19e   : > { %v600_v55 = vpop.permute.xlu1 %599 }
 0x19f   : > { %v613_v57 = vadd.f32 %v600_v55, %v577_v53  ;;  %v614_v58 = vadd.f32 %v600_v55, %v493_v20  ;;  %v615_v59 = vadd.f32 %v600_v55, %v579_v54 }
 0x1a0   : > { %v595_v62 = vpop.permute.xlu0 %594 }
 0x1a1   : > { %v625_v63 = vmax.f32 %v613_v57, 0.0  ;;  %v626_v0 = vmax.f32 %v614_v58, 0.0  ;;  %v627_v1 = vmax.f32 %v615_v59, 0.0  ;;  %v610_v3 = vadd.f32 %v595_v62, %v574_v61 }
 0x1a2   : > { %v611_v5 = vadd.f32 %v595_v62, %v541_v40  ;;  %v612_v6 = vadd.f32 %v595_v62, %v576_v2  ;;  %v555_v7 = vpop.permute.xlu1 %554 }
 0x1a3   : > { %637 = vst [vmem:[%s1071_s7 + $0x30] sm:$0xff] %v625_v63  ;;  %638 = vst [vmem:[%s1071_s7 + $0x38] sm:$0xff] %v626_v0  ;;  %v622_v25 = vmax.f32 %v610_v3, 0.0  ;;  %v559_v10 = vsel %vm558_vm11, %v553_v42, %v555_v7  ;;  %v560_v11 = vsel %vm558_vm11, %v555_v7, %v557_v51 }
 0x1a4   : > { %639 = vst.msk [vmem:[%s1071_s7 + $0x40] sm:$0xff] %vm401_vm3, %v627_v1  ;;  %v623_v12 = vmax.f32 %v611_v5, 0.0  ;;  %v624_v13 = vmax.f32 %v612_v6, 0.0  ;;  %v565_v14 = vadd.f32 %v559_v10, %v516_v4  ;;  %v566_v15 = vadd.f32 %v560_v11, %v548_v9 }
 0x1a5   : > { %634 = vst [vmem:[%s1071_s7 + $0x18] sm:$0xff] %v622_v25 }
 0x1a6   : > { %635 = vst [vmem:[%s1071_s7 + $0x20] sm:$0xff] %v623_v12  ;;  %636 = vst.msk [vmem:[%s1071_s7 + $0x28] sm:$0xff] %vm401_vm3, %v624_v13  ;;  %v608_v16 = vadd.f32 %v1046_v8, %v565_v14  ;;  %v605_v18 = vpop.permute.xlu1 %604 }
 0x1a7   : > { %570 = vst.msk [vmem:[#allocation2 + $0x10] sm:$0xff] %vm401_vm3, %v566_v15  ;;  %v616_v19 = vadd.f32 %v605_v18, %v1032_v44  ;;  %v617_v20 = vadd.f32 %v605_v18, %v1034_v46  ;;  %v618_v21 = vadd.f32 %v605_v18, %v582_v17 }
 0x1a8   : > { %v620_v22 = vmax.f32 %v608_v16, 0.0 }
 0x1a9   : > { %v628_v23 = vmax.f32 %v616_v19, 0.0  ;;  %v629_v24 = vmax.f32 %v617_v20, 0.0  ;;  %v630_v26 = vmax.f32 %v618_v21, 0.0 }
 0x1aa   : > { %632 = vst [vmem:[%s1071_s7 + $0x8] sm:$0xff] %v620_v22 }
 0x1ab   : > { %640 = vst [vmem:[%s1071_s7 + $0x48] sm:$0xff] %v628_v23  ;;  %641 = vst [vmem:[%s1071_s7 + $0x50] sm:$0xff] %v629_v24 }
 0x1ac   : > { %642 = vst.msk [vmem:[%s1071_s7 + $0x58] sm:$0xff] %vm401_vm3, %v630_v26 }
 0x1ae   : > { %v573_v27 = vld [vmem:[#allocation2 + $0x10] sm:$0xff] }
 0x1af   : > { %v609_v44 = vadd.f32 %v1046_v8, %v573_v27 }
 0x1b1   : > { %v621_v46 = vmax.f32 %v609_v44, 0.0 }
 0x1b3   : > { %633 = vst.msk [vmem:[%s1071_s7 + $0x10] sm:$0xff] %vm401_vm3, %v621_v46 }
 0x1b4   : > { %843 = shalt.err (!%p840_p3)
}
 0x1b5   : > { %s844_s26 = scalar_lea.hbm %s1102_s17, 1536  ;;  %s848_s29 = scalar_lea.hbm %s1154_s3, 3072 }
 0x1b6   : > { %p845_p4 = scmp.ne.s32.totalorder %s1102_s17, %s844_s26  ;;  %p849_p9 = scmp.lt.u32.totalorder %s1102_s17, %s1154_s3 }
 0x1b7   : > { %p850_p10 = scmp.lt.u32.totalorder %s848_s29, %s844_s26  ;;  %p852_p12 = scmp.lt.u32.totalorder %s844_s26, %s1102_s17 }
 0x1b8   : > { %p846_p7 = pnand %p845_p4, %p962_p5 }
 0x1b9   : > { %p851_p11 = por %p850_p10, %p849_p9 }
 0x1ba   : > { %p847_p8 = pneg %p846_p7 }
 0x1bb   : > { %p853_p13 = por %p852_p12, %p851_p11 }
 0x1bd   : > { %p854_p0 = pnand %p853_p13, %p847_p8 }
 0x1bf   : > { %857 = shalt.err (!%p854_p0)
}
 0x1c0   : > { %s902_s5 = smov 384   ;;  %s903_s6 = smov 24  }
 0x1c1   : > { %774 = dma.vmem_to_hbm [thread:$0]  (%p962_p5), %s1104_s9, 1536, %s1102_s17, %s1110_s19, %s902_s5, %s902_s5, %s903_s6  }
 0x1c2 PF: > { %p780_p1 = scmp.ge.s32.totalorder %s892_s15, 2  ;;  %s672_s7 = sand.u32 1, %s880_s12  }
 0x1c3   : > { %s673_s8 = scalar_lea.sflag [#allocation4], %s672_s7 }
 0x1c4   : > { %p777_p2 = pnand %p780_p1, %p966_p6 }
 0x1c6   : > { %875 = dma.done.wait (!%p777_p2), %s673_s8, 1536  }
 0x1c7   : > { %877 = vsyncadd (!%p777_p2), %s673_s8, 4294965760  ;;  %p13_p3 = scmp.ge.s32.totalorder %s949_s18, 4   ;;  %s1157_s12 = smov %s884_s13 }
 0x1c8   : > { %s1158_s13 = smov %s888_s14  ;;  %s1159_s14 = smov %s960_s21 }
 0x1c9   : > { %s1160_s15 = smov %s949_s18  ;;  %15 = sbr.rel (!%p13_p3) target bundleno = 3 (0x3), region = 67 }
 0x1d0   :  { %678 = vsyncpa [#allocation4], 1 }
 0x1d1   :  { %680 = vsyncpa [#allocation4 + $0x1], 1 }

</bundles_post_ra>
